<compile_context>
chip_gen: v7x
topology: tpu7x:2x2x1
jax: 0.10.0
libtpu: 0.0.40
codegen_flags: <defaults>
</compile_context>

<pallas_src>
import functools

import jax
import jax.numpy as jnp
from jax import lax
from jax.experimental import pallas as pl
from jax.experimental.pallas import tpu as pltpu

EPS_NORM = 1e-12          # torch F.normalize eps
_EPS_SQ = EPS_NORM * EPS_NORM
_NEG_BIG = -1e30          # softmax mask for padded latent nodes


def _round_up(x, m):
    return ((x + m - 1) // m) * m


def _pick_tile(n, cap):
    """Largest multiple of 128 that divides n (n already a multiple of 128), <= cap."""
    t = min(cap, n)
    t -= t % 128
    while n % t:
        t -= 128
    return t


def _vmem_limit(need_bytes):
    # Cover double-buffered blocks + scratch with headroom; keep under v7x physical.
    return int(min(64 * 2**20, max(32 * 2**20, 2 * need_bytes)))


# --------------------------------------------------------------------------- #
# Call 1: key map -> latent2^T  (per-batch, Nk tiled as a reduction axis)
# --------------------------------------------------------------------------- #
def _latent_kernel(key_ref, wphi_ref, bphi_ref, lat2t_ref, latraw_ref, rowsq_ref,
                   *, n_pad_cols, l_actual, l_pad):
    # key_ref   : (1, C, TK) bf16     wphi_ref: (L_pad, C) bf16   bphi_ref: (L_pad, 1) f32
    # lat2t_ref : (1, C, L_pad) f32 output (latent2 transposed), written at last key tile
    # latraw_ref: (L_pad, C) f32 scratch accumulator; rowsq_ref: (L_pad, 1) f32 scratch
    ki = pl.program_id(1)

    @pl.when(ki == 0)
    def _():
        latraw_ref[...] = jnp.zeros_like(latraw_ref)
        rowsq_ref[...] = jnp.zeros_like(rowsq_ref)

    key = key_ref[0]                                               # (C, TK) bf16
    # phi_func(key): 1x1 conv + folded BN + ReLU (bf16 MXU inputs, f32 accumulation).
    phi_k = lax.dot_general(wphi_ref[...], key, (((1,), (0,)), ((), ())),
                            preferred_element_type=jnp.float32) + bphi_ref[...]
    phi_k = jnp.maximum(phi_k, 0.0)                                # (L_pad, TK) f32

    # latent_raw += phi_k @ key^T : contract the shared N axis directly (no transpose).
    latraw_ref[...] += lax.dot_general(phi_k, key.astype(jnp.float32),
                                       (((1,), (1,)), ((), ())),
                                       preferred_element_type=jnp.float32)
    rowsq_ref[...] += jnp.sum(phi_k * phi_k, axis=1, keepdims=True)

    @pl.when(ki == pl.num_programs(1) - 1)
    def _():
        row_sq = rowsq_ref[...]
        if n_pad_cols:
            # Padded key columns are zero, so they never reach latent_raw; they only
            # add relu(b_phi)^2 per padded column to row_sq -> analytic correction.
            b_relu = jnp.maximum(bphi_ref[...], 0.0)
            row_sq = row_sq - float(n_pad_cols) * b_relu * b_relu

        # F.normalize(phi_k, dim=2) folded onto the tiny (L, C) latent rows
        # (row scaling commutes with the right-multiplication by key^T).
        latent = latraw_ref[...] * lax.rsqrt(jnp.maximum(row_sq, _EPS_SQ))

        # F.normalize(latent, dim=-1)
        ln_sq = jnp.sum(latent * latent, axis=1, keepdims=True)
        latent_n = latent * lax.rsqrt(jnp.maximum(ln_sq, _EPS_SQ))

        # affinity = softmax(latent_n @ latent_n^T, dim=-1)
        aff = lax.dot_general(latent_n, latent_n, (((1,), (1,)), ((), ())),
                              preferred_element_type=jnp.float32)   # (L_pad, L_pad)
        if l_pad != l_actual:
            col = lax.broadcasted_iota(jnp.int32, aff.shape, 1)
            aff = jnp.where(col < l_actual, aff, _NEG_BIG)  # mask padded latent nodes
        aff = jnp.exp(aff - jnp.max(aff, axis=-1, keepdims=True))
        aff = aff * pl.reciprocal(jnp.sum(aff, axis=-1, keepdims=True), approx=False)

        # latent2^T = latent^T @ aff^T, stored as (C, L_pad) so the streaming call's
        # matmul is a plain (C,L)x(L,TN) contraction (no per-tile relayout).
        lat2t_ref[0] = lax.dot_general(latent, aff, (((0,), (1,)), ((), ())),
                                       preferred_element_type=jnp.float32)


# --------------------------------------------------------------------------- #
# Call 2: stream query / output lane tiles (fully parallel grid)
# --------------------------------------------------------------------------- #
def _stream_kernel(lat2t_ref, q_ref, wphip_ref, bphip_ref, out_ref):
    # lat2t_ref: (1, C, L_pad) f32   q_ref: (1, C, TN) bf16   out_ref: (1, C, TN) bf16
    qry = q_ref[0]
    phi_q = lax.dot_general(wphip_ref[...], qry, (((1,), (0,)), ((), ())),
                            preferred_element_type=jnp.float32) + bphip_ref[...]
    phi_q = jnp.maximum(phi_q, 0.0)                                # (L_pad, TN) f32

    # F.normalize(phi_q, dim=1): per spatial column over the latent axis
    # (padded zero rows do not change the norm).
    col_sq = jnp.sum(phi_q * phi_q, axis=0, keepdims=True)
    phi_q_n = phi_q * lax.rsqrt(jnp.maximum(col_sq, _EPS_SQ))

    vis = jnp.dot(lat2t_ref[0], phi_q_n, preferred_element_type=jnp.float32)  # (C, TN)
    out_ref[0] = vis.astype(out_ref.dtype)


# --------------------------------------------------------------------------- #
# Wrapper
# --------------------------------------------------------------------------- #
def fau_forward(query_feature, key_feature, params, *, io_dtype=jnp.bfloat16):
    """query_feature/key_feature: NCHW f32; params: folded conv+BN weights (f32)."""
    B, C, Hq, Wq = query_feature.shape
    _, _, Hk, Wk = key_feature.shape
    Nq, Nk = Hq * Wq, Hk * Wk
    L = params["w_phi"].shape[0]
    L_pad = max(8, _round_up(L, 8))          # fill sublanes; padded rows are zero

    def pad_rows(x):
        return jnp.pad(x, ((0, L_pad - L), (0, 0))) if L_pad != L else x

    # Weights in io_dtype for the MXU / HBM; biases stay f32 (added post-accumulation).
    w_phi = pad_rows(params["w_phi"]).astype(io_dtype)
    w_phip = pad_rows(params["w_phi_prime"]).astype(io_dtype)
    b_phi = pad_rows(params["b_phi"]).astype(jnp.float32)
    b_phip = pad_rows(params["b_phi_prime"]).astype(jnp.float32)

    nk_pad = _round_up(Nk, 128)
    nq_pad = _round_up(Nq, 128)
    key_flat = key_feature.reshape(B, C, Nk).astype(io_dtype)
    q_flat = query_feature.reshape(B, C, Nq).astype(io_dtype)
    # Wrapper-side zero pad only when the spatial size is not lane-aligned.
    # TODO(synk): in-kernel masked tail-tile store to avoid this extra HBM pass.
    if nk_pad != Nk:
        key_flat = jnp.pad(key_flat, ((0, 0), (0, 0), (0, nk_pad - Nk)))
    if nq_pad != Nq:
        q_flat = jnp.pad(q_flat, ((0, 0), (0, 0), (0, nq_pad - Nq)))

    tk = _pick_tile(nk_pad, 1024)
    tn = _pick_tile(nq_pad, 1024)
    n_kt = nk_pad // tk
    n_qt = nq_pad // tn
    isz = jnp.dtype(io_dtype).itemsize

    # ---- call 1: key -> latent2^T (B, C, L_pad) ------------------------------
    lat_kernel = functools.partial(_latent_kernel, n_pad_cols=nk_pad - Nk,
                                   l_actual=L, l_pad=L_pad)
    need1 = (2 * (C * tk * isz + C * L_pad * 4 + L_pad * C * isz + L_pad * 4)
             + L_pad * C * 4 + L_pad * 4)
    latent2t = pl.pallas_call(
        lat_kernel,
        out_shape=jax.ShapeDtypeStruct((B, C, L_pad), jnp.float32),
        grid_spec=pltpu.PrefetchScalarGridSpec(
            num_scalar_prefetch=0,
            grid=(B, n_kt),
            in_specs=[
                pl.BlockSpec((1, C, tk), lambda b, ki: (b, 0, ki)),
                pl.BlockSpec((L_pad, C), lambda b, ki: (0, 0)),
                pl.BlockSpec((L_pad, 1), lambda b, ki: (0, 0)),
            ],
            out_specs=pl.BlockSpec((1, C, L_pad), lambda b, ki: (b, 0, 0)),
            scratch_shapes=[pltpu.VMEM((L_pad, C), jnp.float32),
                            pltpu.VMEM((L_pad, 1), jnp.float32)],
        ),
        compiler_params=pltpu.CompilerParams(
            dimension_semantics=("parallel", "arbitrary"),
            vmem_limit_bytes=_vmem_limit(need1)),
    )(key_flat, w_phi, b_phi)

    # ---- call 2: stream query/output tiles; both axes parallel (megacore) ----
    need2 = 2 * (C * L_pad * 4 + C * tn * isz + L_pad * C * isz
                 + L_pad * 4 + C * tn * isz)
    out = pl.pallas_call(
        _stream_kernel,
        out_shape=jax.ShapeDtypeStruct((B, C, nq_pad), io_dtype),
        grid_spec=pltpu.PrefetchScalarGridSpec(
            num_scalar_prefetch=0,
            grid=(B, n_qt),
            in_specs=[
                pl.BlockSpec((1, C, L_pad), lambda b, qi: (b, 0, 0)),
                pl.BlockSpec((1, C, tn), lambda b, qi: (b, 0, qi)),
                pl.BlockSpec((L_pad, C), lambda b, qi: (0, 0)),
                pl.BlockSpec((L_pad, 1), lambda b, qi: (0, 0)),
            ],
            out_specs=pl.BlockSpec((1, C, tn), lambda b, qi: (b, 0, qi)),
        ),
        compiler_params=pltpu.CompilerParams(
            dimension_semantics=("parallel", "parallel"),
            vmem_limit_bytes=_vmem_limit(need2)),
    )(latent2t, q_flat, w_phip, b_phip)

    if nq_pad != Nq:
        out = out[:, :, :Nq]
    return out.reshape(B, C, Hq, Wq)


# --------------------------------------------------------------------------- #
# Parameter construction (BatchNorm2d eval mode folded into the 1x1 convs)
# --------------------------------------------------------------------------- #
def init_params(key, in_channels, latent_stride):
    L = in_channels // latent_stride
    ks = jax.random.split(key, 8)
    bn_eps = 1e-5

    def make_branch(k_w, k_g, k_b, k_m):
        w = jax.random.normal(k_w, (L, in_channels), jnp.float32) * 0.1
        gamma = 1.0 + 0.1 * jax.random.normal(k_g, (L,), jnp.float32)
        beta = 0.1 * jax.random.normal(k_b, (L,), jnp.float32)
        running_mean = 0.1 * jax.random.normal(k_m, (L,), jnp.float32)
        running_var = jnp.ones((L,), jnp.float32)
        scale = gamma / jnp.sqrt(running_var + bn_eps)
        w_eff = w * scale[:, None]
        b_eff = (beta - scale * running_mean)[:, None]          # (L, 1)
        return w_eff, b_eff

    w_phi, b_phi = make_branch(ks[0], ks[1], ks[2], ks[3])
    w_phip, b_phip = make_branch(ks[4], ks[5], ks[6], ks[7])
    return {"w_phi": w_phi, "b_phi": b_phi,
            "w_phi_prime": w_phip, "b_phi_prime": b_phip}


def fau_reference(query_feature, key_feature, params):
    """Pure-JAX reference mirroring the PyTorch forward, for verification."""
    B, C, Hq, Wq = query_feature.shape
    key_flat = key_feature.reshape(B, C, -1)
    q_flat = query_feature.reshape(B, C, -1)

    def norm(x, axis):
        n = jnp.sqrt(jnp.sum(x * x, axis=axis, keepdims=True))
        return x / jnp.maximum(n, EPS_NORM)

    phi_k = jax.nn.relu(jnp.einsum("lc,bcn->bln", params["w_phi"], key_flat)
                        + params["b_phi"][None])
    phi_k = norm(phi_k, 2)
    latent = jnp.einsum("bln,bcn->blc", phi_k, key_flat)
    latent_n = norm(latent, -1)
    aff = jax.nn.softmax(jnp.einsum("blc,bmc->blm", latent_n, latent_n), axis=-1)
    latent2 = jnp.einsum("blm,bmc->blc", aff, latent)
    phi_q = jax.nn.relu(jnp.einsum("lc,bcn->bln", params["w_phi_prime"], q_flat)
                        + params["b_phi_prime"][None])
    phi_q = norm(phi_q, 1)
    vis = jnp.einsum("blc,bln->bcn", latent2, phi_q)
    return vis.reshape(B, C, Hq, Wq)


if __name__ == "__main__":
    B, C = 2, 8
    latent_stride = 2
    Hk = Wk = 16
    Hq = Wq = 16

    root = jax.random.PRNGKey(0)
    k_q, k_k, k_p = jax.random.split(root, 3)
    query_feature = jax.random.normal(k_q, (B, C, Hq, Wq), jnp.float32)
    key_feature = jax.random.normal(k_k, (B, C, Hk, Wk), jnp.float32)
    params = init_params(k_p, C, latent_stride)

    out = fau_forward(query_feature, key_feature, params)
    out = jax.block_until_ready(out)
    assert out.shape == (B, C, Hq, Wq)

    # Verify against the reference evaluated on the same bf16-rounded inputs/weights
    # (the kernel's I/O precision); kernel math/accumulation is f32, so the residual
    # delta is just the bf16 output store + accumulation order.
    def r(x):
        return x.astype(jnp.bfloat16).astype(jnp.float32)

    params_r = dict(params)
    params_r["w_phi"] = r(params["w_phi"])
    params_r["w_phi_prime"] = r(params["w_phi_prime"])   # biases consumed in f32
    ref = fau_reference(r(query_feature), r(key_feature), params_r)

    out_f32 = out.astype(jnp.float32)
    max_err = float(jnp.max(jnp.abs(out_f32 - ref)))
    assert jnp.allclose(out_f32, ref, atol=1e-2, rtol=1e-2), max_err

    print("KERNEL_OK")
</pallas_src>

<mosaic_0001>
module attributes {stable_mosaic.version = 11 : i64} {
  func.func @_latent_kernel(%arg0: i32, %arg1: i32, %arg2: memref<1x8x256xbf16, #tpu.memory_space<vmem>>, %arg3: memref<8x8xbf16, #tpu.memory_space<vmem>>, %arg4: memref<8x1xf32, #tpu.memory_space<vmem>>, %arg5: memref<1x8x8xf32, #tpu.memory_space<vmem>>, %arg6: memref<8x8xf32, #tpu.memory_space<vmem>>, %arg7: memref<8x1xf32, #tpu.memory_space<vmem>>) attributes {dimension_semantics = [#tpu.dimension_semantics<parallel>, #tpu.dimension_semantics<arbitrary>], iteration_bounds = array<i64: 2, 1>, scalar_prefetch = 0 : i64, scratch_operands = 2 : i64, tpu.core_type = #tpu.core_type<tc>, window_params = [{transform_indices = @transform_0, window_bounds = array<i64: 1, 8, 256>}, {pipeline_mode = #tpu.pipeline_mode<synchronous>, transform_indices = @transform_1, window_bounds = array<i64: 8, 8>}, {pipeline_mode = #tpu.pipeline_mode<synchronous>, transform_indices = @transform_2, window_bounds = array<i64: 8, 1>}, {transform_indices = @transform_3, window_bounds = array<i64: 1, 8, 8>}]} {
    %c0_i32 = arith.constant 0 : i32
    %0 = arith.cmpi eq, %arg1, %c0_i32 : i32
    %1 = arith.extui %0 : i1 to i32
    %c0_i32_0 = arith.constant 0 : i32
    %2 = arith.cmpi ne, %1, %c0_i32_0 : i32
    scf.if %2 {
      %cst_20 = arith.constant 0.000000e+00 : f32
      %26 = vector.broadcast %cst_20 : f32 to vector<8x8xf32>
      %c0_21 = arith.constant 0 : index
      %c0_22 = arith.constant 0 : index
      %27 = vector.load %arg6[%c0_21, %c0_22] : memref<8x8xf32, #tpu.memory_space<vmem>>, vector<8x8xf32>
      tpu.vector_store %arg6[%c0_21, %c0_22], %26 {strides = array<i32>} : memref<8x8xf32, #tpu.memory_space<vmem>>, vector<8x8xf32>,
      %cst_23 = arith.constant 0.000000e+00 : f32
      %28 = vector.broadcast %cst_23 : f32 to vector<8x1xf32>
      %c0_24 = arith.constant 0 : index
      %c0_25 = arith.constant 0 : index
      %29 = vector.load %arg7[%c0_24, %c0_25] : memref<8x1xf32, #tpu.memory_space<vmem>>, vector<8x1xf32>
      tpu.vector_store %arg7[%c0_24, %c0_25], %28 {strides = array<i32>} : memref<8x1xf32, #tpu.memory_space<vmem>>, vector<8x1xf32>,
    } else {
    }
    %c0 = arith.constant 0 : index
    %c0_1 = arith.constant 0 : index
    %c0_2 = arith.constant 0 : index
    %3 = vector.load %arg2[%c0, %c0_1, %c0_2] : memref<1x8x256xbf16, #tpu.memory_space<vmem>>, vector<1x8x256xbf16>
    %4 = vector.shape_cast %3 : vector<1x8x256xbf16> to vector<8x256xbf16>
    %c0_3 = arith.constant 0 : index
    %c0_4 = arith.constant 0 : index
    %5 = vector.load %arg3[%c0_3, %c0_4] : memref<8x8xbf16, #tpu.memory_space<vmem>>, vector<8x8xbf16>
    %cst = arith.constant dense<0.000000e+00> : vector<8x256xf32>
    %6 = tpu.matmul %5, %4, %cst {dimension_numbers = #tpu.dot_dimension_numbers<[1], [0], [0], [1], [0, 0, 1, 1], [], []>} : vector<8x8xbf16>, vector<8x256xbf16>, vector<8x256xf32> -> vector<8x256xf32>
    %c0_5 = arith.constant 0 : index
    %c0_6 = arith.constant 0 : index
    %7 = vector.load %arg4[%c0_5, %c0_6] : memref<8x1xf32, #tpu.memory_space<vmem>>, vector<8x1xf32>
    %8 = vector.broadcast %7 : vector<8x1xf32> to vector<8x256xf32>
    %9 = arith.addf %6, %8 : vector<8x256xf32>
    %cst_7 = arith.constant 0.000000e+00 : f32
    %10 = vector.broadcast %cst_7 : f32 to vector<8x256xf32>
    %11 = arith.maximumf %9, %10 : vector<8x256xf32>
    %c0_8 = arith.constant 0 : index
    %c0_9 = arith.constant 0 : index
    %12 = vector.load %arg6[%c0_8, %c0_9] : memref<8x8xf32, #tpu.memory_space<vmem>>, vector<8x8xf32>
    %13 = arith.extf %4 : vector<8x256xbf16> to vector<8x256xf32>
    %cst_10 = arith.constant dense<0.000000e+00> : vector<8x8xf32>
    %14 = tpu.matmul %11, %13, %cst_10 {dimension_numbers = #tpu.dot_dimension_numbers<[1], [1], [0], [0], [0, 0, 1, 0], [], []>} : vector<8x256xf32>, vector<8x256xf32>, vector<8x8xf32> -> vector<8x8xf32>
    %15 = arith.addf %12, %14 : vector<8x8xf32>
    %c0_11 = arith.constant 0 : index
    %c0_12 = arith.constant 0 : index
    %16 = vector.load %arg6[%c0_11, %c0_12] : memref<8x8xf32, #tpu.memory_space<vmem>>, vector<8x8xf32>
    tpu.vector_store %arg6[%c0_11, %c0_12], %15 {strides = array<i32>} : memref<8x8xf32, #tpu.memory_space<vmem>>, vector<8x8xf32>,
    %c0_13 = arith.constant 0 : index
    %c0_14 = arith.constant 0 : index
    %17 = vector.load %arg7[%c0_13, %c0_14] : memref<8x1xf32, #tpu.memory_space<vmem>>, vector<8x1xf32>
    %18 = arith.mulf %11, %11 : vector<8x256xf32>
    %cst_15 = arith.constant dense<0.000000e+00> : vector<8xf32>
    %19 = vector.multi_reduction <add>, %18, %cst_15 [1] : vector<8x256xf32> to vector<8xf32>
    %20 = vector.shape_cast %19 : vector<8xf32> to vector<8x1xf32>
    %21 = arith.addf %17, %20 : vector<8x1xf32>
    %c0_16 = arith.constant 0 : index
    %c0_17 = arith.constant 0 : index
    %22 = vector.load %arg7[%c0_16, %c0_17] : memref<8x1xf32, #tpu.memory_space<vmem>>, vector<8x1xf32>
    tpu.vector_store %arg7[%c0_16, %c0_17], %21 {strides = array<i32>} : memref<8x1xf32, #tpu.memory_space<vmem>>, vector<8x1xf32>,
    %c0_i32_18 = arith.constant 0 : i32
    %23 = arith.cmpi eq, %arg1, %c0_i32_18 : i32
    %24 = arith.extui %23 : i1 to i32
    %c0_i32_19 = arith.constant 0 : i32
    %25 = arith.cmpi ne, %24, %c0_i32_19 : i32
    scf.if %25 {
      %c0_20 = arith.constant 0 : index
      %c0_21 = arith.constant 0 : index
      %26 = vector.load %arg7[%c0_20, %c0_21] : memref<8x1xf32, #tpu.memory_space<vmem>>, vector<8x1xf32>
      %c0_22 = arith.constant 0 : index
      %c0_23 = arith.constant 0 : index
      %27 = vector.load %arg6[%c0_22, %c0_23] : memref<8x8xf32, #tpu.memory_space<vmem>>, vector<8x8xf32>
      %cst_24 = arith.constant 1.000000e-24 : f32
      %28 = vector.broadcast %cst_24 : f32 to vector<8x1xf32>
      %29 = arith.maximumf %26, %28 : vector<8x1xf32>
      %30 = math.rsqrt %29 : vector<8x1xf32>
      %31 = vector.broadcast %30 : vector<8x1xf32> to vector<8x8xf32>
      %32 = arith.mulf %27, %31 : vector<8x8xf32>
      %33 = arith.mulf %32, %32 : vector<8x8xf32>
      %cst_25 = arith.constant dense<0.000000e+00> : vector<8xf32>
      %34 = vector.multi_reduction <add>, %33, %cst_25 [1] : vector<8x8xf32> to vector<8xf32>
      %35 = vector.shape_cast %34 : vector<8xf32> to vector<8x1xf32>
      %cst_26 = arith.constant 1.000000e-24 : f32
      %36 = vector.broadcast %cst_26 : f32 to vector<8x1xf32>
      %37 = arith.maximumf %35, %36 : vector<8x1xf32>
      %38 = math.rsqrt %37 : vector<8x1xf32>
      %39 = vector.broadcast %38 : vector<8x1xf32> to vector<8x8xf32>
      %40 = arith.mulf %32, %39 : vector<8x8xf32>
      %cst_27 = arith.constant dense<0.000000e+00> : vector<8x8xf32>
      %41 = tpu.matmul %40, %40, %cst_27 {dimension_numbers = #tpu.dot_dimension_numbers<[1], [1], [0], [0], [0, 0, 1, 0], [], []>} : vector<8x8xf32>, vector<8x8xf32>, vector<8x8xf32> -> vector<8x8xf32>
      %42 = tpu.iota {dimensions = array<i32: 1>} : vector<8x8xi32>
      %c4_i32 = arith.constant 4 : i32
      %43 = vector.broadcast %c4_i32 : i32 to vector<8x8xi32>
      %44 = arith.cmpi slt, %42, %43 : vector<8x8xi32>
      %cst_28 = arith.constant -1.000000e+30 : f32
      %45 = vector.broadcast %cst_28 : f32 to vector<8x8xf32>
      %46 = arith.select %44, %41, %45 : vector<8x8xi1>, vector<8x8xf32>
      %cst_29 = arith.constant dense<0xFF800000> : vector<8xf32>
      %47 = vector.multi_reduction <maximumf>, %46, %cst_29 [1] : vector<8x8xf32> to vector<8xf32>
      %48 = vector.shape_cast %47 : vector<8xf32> to vector<8x1xf32>
      %49 = vector.broadcast %48 : vector<8x1xf32> to vector<8x8xf32>
      %50 = arith.subf %46, %49 : vector<8x8xf32>
      %51 = math.exp %50 : vector<8x8xf32>
      %cst_30 = arith.constant dense<0.000000e+00> : vector<8xf32>
      %52 = vector.multi_reduction <add>, %51, %cst_30 [1] : vector<8x8xf32> to vector<8xf32>
      %53 = vector.shape_cast %52 : vector<8xf32> to vector<8x1xf32>
      %54 = tpu.reciprocal %53 : vector<8x1xf32> -> vector<8x1xf32>
      %55 = vector.broadcast %54 : vector<8x1xf32> to vector<8x8xf32>
      %56 = arith.mulf %51, %55 : vector<8x8xf32>
      %cst_31 = arith.constant dense<0.000000e+00> : vector<8x8xf32>
      %57 = tpu.matmul %32, %56, %cst_31 {dimension_numbers = #tpu.dot_dimension_numbers<[0], [1], [1], [0], [0, 1, 1, 0], [], []>} : vector<8x8xf32>, vector<8x8xf32>, vector<8x8xf32> -> vector<8x8xf32>
      %c0_32 = arith.constant 0 : index
      %c0_33 = arith.constant 0 : index
      %c0_34 = arith.constant 0 : index
      %58 = vector.load %arg5[%c0_32, %c0_33, %c0_34] : memref<1x8x8xf32, #tpu.memory_space<vmem>>, vector<1x8x8xf32>
      %59 = vector.shape_cast %58 : vector<1x8x8xf32> to vector<8x8xf32>
      %60 = vector.shape_cast %57 : vector<8x8xf32> to vector<1x8x8xf32>
      tpu.vector_store %arg5[%c0_32, %c0_33, %c0_34], %60 {strides = array<i32>} : memref<1x8x8xf32, #tpu.memory_space<vmem>>, vector<1x8x8xf32>,
    } else {
    }
    return
  }
  func.func @transform_0(%arg0: i32, %arg1: i32) -> (i32, i32, i32) {
    %c0_i32 = arith.constant 0 : i32
    %c0_i32_0 = arith.constant 0 : i32
    return %arg0, %c0_i32, %arg1 : i32, i32, i32
  }
  func.func @transform_1(%arg0: i32, %arg1: i32) -> (i32, i32) {
    %c0_i32 = arith.constant 0 : i32
    %c0_i32_0 = arith.constant 0 : i32
    %c0_i32_1 = arith.constant 0 : i32
    return %c0_i32, %c0_i32_0 : i32, i32
  }
  func.func @transform_2(%arg0: i32, %arg1: i32) -> (i32, i32) {
    %c0_i32 = arith.constant 0 : i32
    %c0_i32_0 = arith.constant 0 : i32
    %c0_i32_1 = arith.constant 0 : i32
    return %c0_i32, %c0_i32_0 : i32, i32
  }
  func.func @transform_3(%arg0: i32, %arg1: i32) -> (i32, i32, i32) {
    %c0_i32 = arith.constant 0 : i32
    %c0_i32_0 = arith.constant 0 : i32
    %c0_i32_1 = arith.constant 0 : i32
    return %arg0, %c0_i32, %c0_i32_0 : i32, i32, i32
  }
}

</mosaic_0001>

<bundles_post_ra>
// kernel: tpu_custom_call.1
= control target key start
LH: loop header
LB: loop body
LE: loop exit
PB: predicated region body
PF: predicated region fallthrough
CT: control target
= control target key end

     0   :  { %8 = vsyncpa [#allocation5], 0  ;;  %s1124_s0 = inlined_call_operand.hbm [shape: bf16[2,8,256], index: 0, kind: input, shape index: {}]   ;;  %s1125_s1 = inlined_call_operand.vmem [shape: bf16[8,8], index: 1, kind: input, shape index: {}]   ;;  %s1126_s2 = inlined_call_operand.vmem [shape: f32[8,1], index: 2, kind: input, shape index: {}]   ;;  %s1127_s3 = inlined_call_operand.hbm [shape: f32[2,8,8], index: 3, kind: output, shape index: {}]  }
   0x1   :  { %10 = vsyncpa [#allocation5 + $0x1], 0 }
   0x2   :  { %11 = vsyncpa [#allocation6], 0 }
   0x3   :  { %13 = vsyncpa [#allocation6 + $0x1], 0  ;;  %s929_s12 = smov 0   ;;  %s931_s13 = smov 0  }
   0x4   :  { %s933_s14 = smov 0   ;;  %s935_s15 = smov 0  }
   0x5   :  { %s937_s16 = smov 0   ;;  %s939_s17 = smov 0  }
   0x6 LB: > { %s676_s18 = sadd.s32 4294967295, %s902_s17   ;;  %s677_s19 = sadd.s32 4294967294, %s902_s17   ;;  %s902_s17 = sphi %s939_s17, %s19_s17   ;;  %s898_s16 = sphi %s937_s16, %s1143_s16   ;;  %s894_s15 = sphi %s935_s15, %s1142_s15   ;;  %s890_s14 = sphi %s933_s14, %s1141_s14   ;;  %s886_s13 = sphi %s931_s13, %s1140_s13   ;;  %s882_s12 = sphi %s929_s12, %s1139_s12  }
   0x7   : > { %s31_s20 = sadd.s32 1, %s898_s16  ;;  %s40_s21 = sadd.s32 1, %s890_s14 }
   0x8   : > { %p33_p0 = scmp.ge.s32.totalorder %s31_s20, 2  ;;  %p47_p1 = scmp.ne.s32.totalorder %s890_s14, %s886_s13 }
   0x9   : > { %p48_p2 = scmp.eq.s32.totalorder %s902_s17, 0  ;;  %p53_p3 = scmp.ne.s32.totalorder %s886_s13, %s882_s12 }
   0xa   : > { %s1145_s20 = smov (%p33_p0, %s31_s20), 0  ;;  %p54_p5 = scmp.eq.s32.totalorder %s676_s18, 0 }
   0xb   : > { %p970_p4 = por %p48_p2, %p47_p1  ;;  %s35_s23 = ssub.s32 %s898_s16, %s1145_s20 }
   0xc   : > { %p119_p6 = scmp.eq.s32.totalorder %s676_s18, 1  ;;  %p38_p7 = scmp.eq.s32.totalorder %s35_s23, 0 }
   0xd   : > { %p976_p8 = por %p54_p5, %p53_p3  ;;  %p125_p10 = scmp.eq.s32.totalorder %s677_s19, 1 }
   0xe   : > { %p980_p9 = por %p119_p6, %p47_p1  ;;  %p725_p13 = scmp.lt.s32.totalorder %s902_s17, 2 }
   0xf   : > { %s985_s26 = scalar_select %p38_p7, %s890_s14, %s40_s21  }
  0x10   : > { %s1131_s25 = scalar_select %p980_p9, 1, 0 }
  0x11   : > { %p987_p11 = por %p125_p10, %p53_p3  ;;  %s151_s28 = sand.u32 1, %s890_s14  }
  0x12   : > { %s680_s29 = sshll.u32 %s151_s28, 3  ;;  %s698_s30 = sshll.u32 %s898_s16, 7 }
  0x13   : > { %s1132_s27 = scalar_select %p987_p11, 1, 0 }
  0x14   : > { %s998_s6 = scalar_lea.hbm %s1124_s0, %s698_s30  ;;  %s155_s7 = scalar_lea.vmem [#allocation4], %s680_s29 }
  0x15   : > { %s165_s8 = sshll.u32 %s155_s7, 4  ;;  %p1004_p0 = pnand %p725_p13, %p970_p4  ;;  %s1000_s8 = int_to_ptr.vmem [resolvable:$true] %s165_s8 }
  0x16   : > { %s152_s10 = scalar_lea.sflag [#allocation5], %s151_s28  ;;  %s790_s11 = scalar_lea.hbm %s998_s6, 128 }
  0x17   : > { %p791_p3 = scmp.ne.s32.totalorder %s998_s6, %s790_s11  ;;  %p792_p5 = pneg %p1004_p0 }
  0x18   : > { %s795_s21 = scalar_lea.hbm %s1124_s0, 256  ;;  %p796_p4 = scmp.lt.u32.totalorder %s998_s6, %s1124_s0 }
  0x19   : > { %p793_p6 = pnand %p792_p5, %p791_p3  ;;  %p797_p10 = scmp.lt.u32.totalorder %s795_s21, %s790_s11 }
  0x1a   : > { %p799_p12 = scmp.lt.u32.totalorder %s790_s11, %s998_s6 }
  0x1b   : > { %p794_p7 = pneg %p793_p6  ;;  %p798_p13 = por %p797_p10, %p796_p4 }
  0x1d   : > { %p800_p1 = por %p799_p12, %p798_p13 }
  0x1f   : > { %p801_p2 = pnand %p800_p1, %p794_p7 }
  0x21   : > { %804 = shalt.err (!%p801_p2)
}
  0x22   : > { %s805_s28 = scalar_lea.vmem %s1000_s8, 128  ;;  %s904_s29 = smov [#allocation4]  }
  0x23   : > { %p806_p3 = scmp.ne.s32.totalorder %s1000_s8, %s805_s28  ;;  %s810_s30 = sshll.u32 %s904_s29, 4  ;;  %s811_s30 = int_to_ptr.vmem [resolvable:$false] %s810_s30 }
  0x24   : > { %s812_s4 = scalar_lea.vmem %s811_s30, 256  ;;  %p813_p9 = scmp.lt.s32.totalorder %s1000_s8, %s811_s30 }
  0x25   : > { %p808_p6 = pnand %p806_p3, %p792_p5  ;;  %p814_p4 = scmp.lt.s32.totalorder %s812_s4, %s805_s28 }
  0x27   : > { %p809_p11 = pneg %p808_p6  ;;  %p815_p10 = por %p814_p4, %p813_p9 }
  0x29   : > { %p816_p12 = pnand %p815_p10, %p809_p11 }
  0x2b   : > { %819 = shalt.err (!%p816_p12)
}
  0x2c   : > { %720 = dma.hbm_to_vmem [thread:$0]  (!%p1004_p0), %s998_s6, 128, %s1000_s8, %s152_s10  }
  0x2d   : > { %p1134_p1 = scmp.lt.s32.totalorder %s902_s17, 3  ;;  %p1135_p2 = scmp.ge.s32.totalorder %s902_s17, 1 }
  0x2f   : > { %p171_p5 = pnand %p1135_p2, %p1134_p1 }
  0x30   : > { %s1040_s5 = sand.u32 (!%p171_p5), 1, %s886_s13  }
  0x31   : > { %174 = sbr.rel (%p171_p5) target bundleno = 1499 (0x5db), region = 32  ;;  %s684_s7 = sshll.u32 (!%p171_p5), %s1040_s5, 3 }
  0x32   : > { %s177_s11 = scalar_lea.sflag (!%p171_p5), [#allocation5], %s1040_s5  ;;  %s180_s9 = scalar_lea.vmem (!%p171_p5), [#allocation4], %s684_s7 }
  0x38   : > { %873 = dma.done.wait (%p976_p8), %s177_s11, 128  }
  0x39   : > { %875 = vsyncadd (%p976_p8), %s177_s11, 4294967168  ;;  %v905_v0 = vmov 0   ;;  %v213_v1 = vld [vmem:[%s180_s9] sm:$0xff]  ;;  %vm230_vm0 = vcmask 1043456   ;;  %v215_v2 = vld [vmem:[%s1126_s2] sm:$0xff]  ;;  %vm209_vm1 = vcmask 64512   ;;  %v457_v41 = vlaneseq }
  0x3a   : > { %269 = vmatprep.mubr.bf16.mxu0 %v905_v0  ;;  %778 = vset.pattern.permute.xlu0 %v905_v0  ;;  %v687_v3 = vcombine.high %v213_v1, %v213_v1  ;;  %v686_v4 = vcombine.low %v213_v1, %v213_v1  ;;  %v214_v6 = vld [vmem:[%s1125_s1] sm:$0xf]  ;;  %v282_v7 = vunpack.c.h.bf16 %v213_v1  ;;  %v281_v8 = vunpack.c.l.bf16 %v213_v1  ;;  %s695_s18 = sshll.u32 %s894_s15, 7  ;;  %s202_s19 = scalar_lea.vmem [#allocation7], %s684_s7 }
  0x3b   : > { %779 = vset.pattern.permute.xlu1 %v905_v0  ;;  %218 = vperm.xlu0 %778, %v215_v2   ;;  %vm211_vm2 = vcmask 7168   ;;  %v906_v9 = vmov 0.0   ;;  %vm907_vm3 = vmmov 0   ;;  %v458_v42 = vand.u32 127, %v457_v41  ;;  %s595_s21 = sshll.u32 %s202_s19, 4  ;;  %s1074_s28 = scalar_lea.hbm %s1127_s3, %s695_s18  ;;  %s1076_s21 = int_to_ptr.vmem [resolvable:$true] %s595_s21 }
  0x3c   : > { %688 = vmatprep.subr.msk.bf16.mxu0 %vm230_vm0, %v687_v3  ;;  %v232_v5 = vsel %vm230_vm0, %v686_v4, 0  ;;  %283 = vmatprep.subr.mxu1 %v282_v7  ;;  %212 = vst.msk [vmem:[#allocation3] sm:$0xff] %vm211_vm2, %v906_v9  ;;  %s582_s29 = scalar_lea.sflag [#allocation6], %s1040_s5  ;;  %s820_s30 = scalar_lea.vmem %s1076_s21, 128 }
  0x3d   : > { %238 = vmatpush1.bf16.msra.mxu0 %v232_v5  ;;  %284 = vmatpush1.xpose.msra.mxu1 %v281_v8  ;;  %210 = vst.msk [vmem:[#allocation2] sm:$0xff] %vm209_vm1, %v906_v9  ;;  %vm459_vm4 = vcmp.lt.s32.totalorder %v458_v42, 4  ;;  %p821_p8 = scmp.ne.s32.totalorder %s1076_s21, %s820_s30  ;;  %p1136_p9 = scmp.ne.s32.totalorder %s1131_s25, 0 }
  0x3e   : > { %703 = vmatprep.subr.mxu1 %v906_v9  ;;  %708 = vmatprep.subr.mxu0 %v906_v9  ;;  %s908_s15 = smov [#allocation7]  }
  0x3f   : > { %p822_p11 = pnand %p821_p8, %p1136_p9  ;;  %s824_s4 = sshll.u32 %s908_s15, 4  ;;  %s825_s4 = int_to_ptr.vmem [resolvable:$false] %s824_s4 }
  0x40   : > { %689 = vmatmul.mubr.msk.bf16.vlgmr.msra.gmra.mrb[0].mxu0 %vm209_vm1, %v214_v6  ;;  %s826_s7 = scalar_lea.vmem %s825_s4, 256  ;;  %p827_p7 = scmp.lt.s32.totalorder %s1076_s21, %s825_s4 }
  0x41   : > { %710 = vmatprep.mubr.msk.f32.mxu0 %vm907_vm3, %v906_v9  ;;  %p823_p0 = pneg %p822_p11  ;;  %p828_p13 = scmp.lt.s32.totalorder %s826_s7, %s820_s30 }
  0x43   : > { %v355_v22 = vld [vmem:[#allocation3] sm:$0xff]  ;;  %p829_p3 = por %p828_p13, %p827_p7 }
  0x44   : > { %v280_v28 = vld [vmem:[#allocation2] sm:$0xff] }
  0x45   : > { %p830_p6 = pnand %p829_p3, %p823_p0 }
  0xba   : > { %v219_v10 = vpop.permute.xlu0 %218 }
 0x113   : > { %v271_v11 = vpop.f32.mrb[0].mxu0 }
 0x114   : > { %v272_v12 = vadd.f32 %v271_v11, %v219_v10  ;;  %v273_v13 = vpop.f32.mrb[1].mxu0 }
 0x115   : > { %v274_v14 = vadd.f32 %v273_v13, %v219_v10  ;;  %v275_v15 = vpop.f32.mrb[2].mxu0 }
 0x116   : > { %v278_v16 = vmax.f32 %v272_v12, 0.0  ;;  %v276_v17 = vpop.f32.mrb[3].mxu0 }
 0x117   : > { %v279_v18 = vmax.f32 %v274_v14, 0.0 }
 0x118   : > { %v356_v19 = vmul.f32 %v278_v16, %v278_v16 }
 0x119   : > { %v357_v20 = vmul.f32 %v279_v18, %v279_v18  ;;  %347 = vmatprep.mubr.f32.mxu1 %v279_v18 }
 0x11a   : > { %348 = vmatmul.mubr.f32.vlgmr.msra.gmra.mrb[0].mxu1 %v278_v16 }
 0x11b   : > { %v358_v21 = vadd.f32 %v357_v20, %v356_v19  ;;  %705 = vmatprep.mubr.msk.f32.mxu1 %vm907_vm3, %v906_v9 }
 0x11d   : > { %359 = vadd.xlane.f32.xlu0 %v358_v21 }
 0x1aa   : > { %v360_v23 = vpop.xlane.xlu0 %359 }
 0x1ab   : > { %v361_v24 = vadd.f32 %v360_v23, %v355_v22 }
 0x1ad   : > { %363 = vst.msk [vmem:[#allocation3] sm:$0xff] %vm211_vm2, %v361_v24 }
 0x1b4   : > { %v367_v25 = vld [vmem:[#allocation3] sm:$0xff] }
 0x1b5   : > { %v369_v26 = vmax.f32 %v367_v25, 1e-24 }
 0x1b7   : > { %782 = vrsqrt.f32 %v369_v26 }
 0x1c1   : > { %v783_v27 = vpop.eup %782 }
 0x1c2   : > { %373 = vperm.xlu1 %779, %v783_v27  }
 0x1ed   : > { %v349_v29 = vpop.f32.mrb[0].mxu1 }
 0x1ee   : > { %v353_v30 = vadd.f32 %v349_v29, %v280_v28  ;;  %v351_v31 = vpop.f32.mrb[1].mxu1 }
 0x1f0   : > { %354 = vst.msk [vmem:[#allocation2] sm:$0xff] %vm209_vm1, %v353_v30 }
 0x1f7   : > { %v368_v33 = vld [vmem:[#allocation2] sm:$0xff] }
 0x241   : > { %v374_v32 = vpop.permute.xlu1 %373 }
 0x242   : > { %v376_v34 = vmul.f32 %v374_v32, %v368_v33 }
 0x244   : > { %v377_v35 = vmul.f32 %v376_v34, %v376_v34 }
 0x246   : > { %v378_v36 = vsel %vm209_vm1, %v377_v35, 0.0 }
 0x247   : > { %379 = vadd.xlane.f32.xlu1 %v378_v36 }
 0x27a   : > { %472 = vxpose.xlu1.b32.start.end [1/1] (short) (narrow) %v376_v34, 8 }
 0x2d4   : > { %v380_v37 = vpop.xlane.xlu1 %379 }
 0x2d5   : > { %v381_v38 = vmax.f32 %v380_v37, 1e-24 }
 0x2d7   : > { %784 = vrsqrt.f32 %v381_v38 }
 0x2e1   : > { %v785_v39 = vpop.eup %784 }
 0x2e2   : > { %v383_v40 = vmul.f32 %v785_v39, %v376_v34 }
 0x2e4   : > { %704 = vmatpush3.xpose.msk.msra.mxu1 %vm209_vm1, %v383_v40 }
 0x2e7   : > { %706 = vmatmul.mubr.msk.f32.vlgmr.msra.gmra.mrb[2].mxu1 %vm209_vm1, %v383_v40 }
 0x2fa   : > { %v488_v55 = vpop.trf.xlu1 }
 0x3ba   : > { %v453_v43 = vpop.f32.mrb[2].mxu1 }
 0x3bb   : > { %v460_v44 = vsel %vm459_vm4, %v453_v43, -1e+30  ;;  %v707_v45 = vpop.f32.mrb[3].mxu1 }
 0x3bc   : > { %v461_v46 = vsel %vm209_vm1, %v460_v44, -inf }
 0x3bd   : > { %462 = vmax.xlane.f32.xlu0 %v461_v46 }
 0x44a   : > { %v463_v47 = vpop.xlane.xlu0 %462 }
 0x44b   : > { %v464_v48 = vsub.f32 %v460_v44, %v463_v47 }
 0x44d   : > { %v465_v49 = vmul.f32 1.442695, %v464_v48 }
 0x44f   : > { %786 = vpow2.f32 %v465_v49 }
 0x459   : > { %v787_v50 = vpop.eup %786 }
 0x45a   : > { %v467_v51 = vsel %vm209_vm1, %v787_v50, 0.0 }
 0x45b   : > { %468 = vadd.xlane.f32.xlu0 %v467_v51 }
 0x4e8   : > { %v469_v52 = vpop.xlane.xlu0 %468 }
 0x4e9   : > { %788 = vrcp.f32 %v469_v52 }
 0x4f3   : > { %v789_v53 = vpop.eup %788 }
 0x4f4   : > { %v471_v54 = vmul.f32 %v789_v53, %v787_v50 }
 0x4f6   : > { %709 = vmatpush3.xpose.msk.msra.mxu0 %vm209_vm1, %v471_v54 }
 0x4f9   : > { %711 = vmatmul.mubr.msk.f32.vlgmr.msra.gmra.mrb[4].mxu0 %vm209_vm1, %v488_v55 }
 0x5cc   : > { %v576_v56 = vpop.f32.mrb[4].mxu0 }
 0x5cd   : > { %580 = vst.msk [vmem:[%s202_s19] sm:$0xff] %vm209_vm1, %v576_v56  ;;  %v712_v57 = vpop.f32.mrb[5].mxu0 }
 0x5ce   : > { %833 = shalt.err (!%p830_p6)
}
 0x5cf   : > { %s834_s5 = scalar_lea.hbm %s1074_s28, 128  ;;  %s838_s6 = scalar_lea.hbm %s1127_s3, 256 }
 0x5d0   : > { %p835_p4 = scmp.ne.s32.totalorder %s1074_s28, %s834_s5  ;;  %p839_p1 = scmp.lt.u32.totalorder %s1074_s28, %s1127_s3 }
 0x5d1   : > { %p840_p2 = scmp.lt.u32.totalorder %s838_s6, %s834_s5  ;;  %p842_p8 = scmp.lt.u32.totalorder %s834_s5, %s1074_s28 }
 0x5d2   : > { %p836_p10 = pnand %p835_p4, %p1136_p9 }
 0x5d3   : > { %p841_p5 = por %p840_p2, %p839_p1 }
 0x5d4   : > { %p837_p12 = pneg %p836_p10 }
 0x5d5   : > { %p843_p11 = por %p842_p8, %p841_p5 }
 0x5d7   : > { %p844_p0 = pnand %p843_p11, %p837_p12 }
 0x5d9   : > { %847 = shalt.err (!%p844_p0)
}
 0x5da   : > { %715 = dma.vmem_to_hbm [thread:$0]  (%p1136_p9), %s1076_s21, 128, %s1074_s28, %s582_s29  }
 0x5db PF: > { %s607_s24 = sand.u32 1, %s882_s12   ;;  %p1137_p7 = scmp.ne.s32.totalorder %s1132_s27, 0 }
 0x5dc   : > { %p1138_p13 = scmp.ge.s32.totalorder %s902_s17, 2  ;;  %s608_s18 = scalar_lea.sflag [#allocation6], %s607_s24 }
 0x5de   : > { %p722_p3 = pnand %p1138_p13, %p1137_p7 }
 0x5e0   : > { %877 = dma.done.wait (!%p722_p3), %s608_s18, 128  }
 0x5e1   : > { %879 = vsyncadd (!%p722_p3), %s608_s18, 4294967168  ;;  %s19_s17 = sadd.s32 1, %s902_s17   ;;  %s1139_s12 = smov %s886_s13 }
 0x5e2   : > { %p16_p6 = scmp.ge.s32.totalorder %s19_s17, 4   ;;  %s1140_s13 = smov %s890_s14 }
 0x5e3   : > { %s1141_s14 = smov %s985_s26  ;;  %s1142_s15 = smov %s898_s16 }
 0x5e4   : > { %s1143_s16 = smov %s1145_s20  ;;  %18 = sbr.rel (!%p16_p6) target bundleno = 6 (0x6), region = 85 }
 0x5eb   :  { %613 = vsyncpa [#allocation5], 1 }
 0x5ec   :  { %615 = vsyncpa [#allocation5 + $0x1], 1 }
 0x5ed   :  { %616 = vsyncpa [#allocation6], 1 }
 0x5ee   :  { %618 = vsyncpa [#allocation6 + $0x1], 1 }

</bundles_post_ra>
